<compile_context>
chip_gen: v7x
topology: tpu7x:2x2x1
jax: 0.10.0
libtpu: 0.0.40
codegen_flags: <defaults>
</compile_context>

<pallas_src>
import functools

import jax
import jax.numpy as jnp
from jax.experimental import pallas as pl
from jax.experimental.pallas import tpu as pltpu


def _series_decomp_kernel(x_ref, res_ref, mean_ref, pbuf_ref, *,
                          kernel_size, seq_len, pad, lp_al):
    # x_ref / res_ref / mean_ref: (L, C) blocks (batch dim squeezed away),
    # pbuf_ref: (lp_al, C) f32 scratch holding the replicate-padded sequence.
    c = x_ref.shape[-1]
    x = x_ref[...].astype(jnp.float32)                       # (L, C)

    # Build the replicate-padded sequence in VMEM (never touches HBM).
    if pad > 0:
        pbuf_ref[0:pad, :] = jnp.broadcast_to(x[0:1, :], (pad, c))
    pbuf_ref[pad:pad + seq_len, :] = x
    tail = lp_al - (pad + seq_len)
    if tail > 0:
        pbuf_ref[pad + seq_len:lp_al, :] = jnp.broadcast_to(
            x[seq_len - 1:seq_len, :], (tail, c))
    p = pbuf_ref[...]                                        # (lp_al, C) f32

    # Width-k windowed sum via O(log k) doubling.  acc[t] = sum_{j<k} p[t+j]
    # for every t in [0, L-1]; rolls are circular but wrapped garbage only
    # lands at positions >= L that are never read for the final outputs.
    s, w, offset, acc, kk = p, 1, 0, None, kernel_size
    while kk > 0:
        if kk & 1:
            term = s if offset == 0 else pltpu.roll(s, lp_al - offset, axis=0)
            acc = term if acc is None else acc + term
            offset += w
        kk >>= 1
        if kk:
            s = s + pltpu.roll(s, lp_al - w, axis=0)
            w *= 2

    mean = acc[0:seq_len, :] * (1.0 / kernel_size)
    res_ref[...] = (x - mean).astype(res_ref.dtype)
    mean_ref[...] = mean.astype(mean_ref.dtype)


def _pick_channel_tile(C, L, itemsize):
    """Largest channel tile (multiple of 128, dividing C) with modest VMEM use."""
    if C % 128 != 0:
        return C  # block must equal the full dim when not 128-divisible
    budget = 4 * 1024 * 1024  # ~4 MiB per (L, c_tile) f32 buffer
    c_tile = 128
    while (c_tile * 2 <= 512 and C % (c_tile * 2) == 0
           and L * (c_tile * 2) * max(itemsize, 4) <= budget):
        c_tile *= 2
    return c_tile


def series_decomp(x, kernel_size):
    """x: (B, L, C) float array. Returns (res, moving_mean), both (B, L, C)."""
    if kernel_size % 2 != 1:
        raise ValueError("series_decomp requires an odd kernel_size (the "
                         "PyTorch reference breaks for even sizes too).")
    B, L, C = x.shape
    pad = (kernel_size - 1) // 2
    lp = L + 2 * pad                     # padded length actually needed
    lp_al = ((lp + 7) // 8) * 8          # round to sublane multiple for clean rolls

    itemsize = jnp.dtype(x.dtype).itemsize
    c_tile = _pick_channel_tile(C, L, itemsize)
    nc = C // c_tile

    # in/out blocks are double-buffered by the pipeline; scratch is single.
    est = (2 * L * c_tile * itemsize           # x
           + 2 * 2 * L * c_tile * itemsize     # res, mean
           + lp_al * c_tile * 4)               # padded scratch (f32)
    vmem_limit = int(min(96 * 2 ** 20, max(32 * 2 ** 20, 2 * est)))

    kernel = functools.partial(
        _series_decomp_kernel,
        kernel_size=kernel_size, seq_len=L, pad=pad, lp_al=lp_al)

    # NOTE: for very small C (<128) a (B, C, L) lane-major layout would make
    # stores lane-dense, but the wrapper transposes would re-add the HBM round
    # trip this version just removed, so we keep the module's native layout.
    res, mean = pl.pallas_call(
        kernel,
        out_shape=(
            jax.ShapeDtypeStruct((B, L, C), x.dtype),
            jax.ShapeDtypeStruct((B, L, C), x.dtype),
        ),
        grid_spec=pltpu.PrefetchScalarGridSpec(
            num_scalar_prefetch=0,
            grid=(B, nc),
            in_specs=[
                pl.BlockSpec((None, L, c_tile), lambda b, c: (b, 0, c)),
            ],
            out_specs=[
                pl.BlockSpec((None, L, c_tile), lambda b, c: (b, 0, c)),
                pl.BlockSpec((None, L, c_tile), lambda b, c: (b, 0, c)),
            ],
            scratch_shapes=[pltpu.VMEM((lp_al, c_tile), jnp.float32)],
        ),
        compiler_params=pltpu.CompilerParams(
            dimension_semantics=("parallel", "parallel"),
            vmem_limit_bytes=vmem_limit,
        ),
    )(x)
    return res, mean


def _reference_series_decomp(x, kernel_size):
    """Pure-JAX reference mirroring the PyTorch module semantics."""
    B, L, C = x.shape
    pad = (kernel_size - 1) // 2
    front = jnp.repeat(x[:, 0:1, :], pad, axis=1)
    end = jnp.repeat(x[:, L - 1:L, :], pad, axis=1)
    xp = jnp.concatenate([front, x, end], axis=1)
    # AvgPool1d(kernel_size, stride=1, padding=0) over the seq axis.
    windows = jnp.stack([xp[:, j:j + L, :] for j in range(kernel_size)], axis=0)
    mean = jnp.mean(windows, axis=0)
    return x - mean, mean


if __name__ == "__main__":
    B, L, C = 2, 16, 8
    key = jax.random.PRNGKey(0)
    x = jax.random.normal(key, (B, L, C), dtype=jnp.float32)

    for kernel_size in (5, 25):   # small k and a multi-bit k (25 = 16+8+1)
        res, mean = series_decomp(x, kernel_size)
        jax.block_until_ready((res, mean))

        res_ref, mean_ref = _reference_series_decomp(x, kernel_size)
        assert jnp.allclose(res, res_ref, atol=1e-5, rtol=1e-5)
        assert jnp.allclose(mean, mean_ref, atol=1e-5, rtol=1e-5)

    print("KERNEL_OK")
</pallas_src>

<mosaic_0001>
module attributes {stable_mosaic.version = 11 : i64} {
  func.func @_series_decomp_kernel(%arg0: i32, %arg1: i32, %arg2: memref<1x16x8xf32, #tpu.memory_space<vmem>>, %arg3: memref<1x16x8xf32, #tpu.memory_space<vmem>>, %arg4: memref<1x16x8xf32, #tpu.memory_space<vmem>>, %arg5: memref<24x8xf32, #tpu.memory_space<vmem>>) attributes {dimension_semantics = [#tpu.dimension_semantics<parallel>, #tpu.dimension_semantics<parallel>], iteration_bounds = array<i64: 2, 1>, scalar_prefetch = 0 : i64, scratch_operands = 1 : i64, tpu.core_type = #tpu.core_type<tc>, window_params = [{transform_indices = @transform_0, window_bounds = array<i64: 1, 16, 8>}, {transform_indices = @transform_1, window_bounds = array<i64: 1, 16, 8>}, {transform_indices = @transform_2, window_bounds = array<i64: 1, 16, 8>}]} {
    %c0 = arith.constant 0 : index
    %c0_0 = arith.constant 0 : index
    %c0_1 = arith.constant 0 : index
    %0 = vector.load %arg2[%c0, %c0_0, %c0_1] : memref<1x16x8xf32, #tpu.memory_space<vmem>>, vector<1x16x8xf32>
    %1 = vector.shape_cast %0 : vector<1x16x8xf32> to vector<16x8xf32>
    %2 = vector.extract_strided_slice %1 {offsets = [0, 0], sizes = [1, 8], strides = [1, 1]} : vector<16x8xf32> to vector<1x8xf32>
    %3 = vector.shape_cast %2 : vector<1x8xf32> to vector<1x8xf32>
    %4 = vector.broadcast %3 : vector<1x8xf32> to vector<2x8xf32>
    %c0_2 = arith.constant 0 : index
    %c0_3 = arith.constant 0 : index
    %5 = vector.load %arg5[%c0_2, %c0_3] : memref<24x8xf32, #tpu.memory_space<vmem>>, vector<2x8xf32>
    tpu.vector_store %arg5[%c0_2, %c0_3], %4 {strides = array<i32>} : memref<24x8xf32, #tpu.memory_space<vmem>>, vector<2x8xf32>,
    %c2 = arith.constant 2 : index
    %c0_4 = arith.constant 0 : index
    %6 = vector.load %arg5[%c2, %c0_4] : memref<24x8xf32, #tpu.memory_space<vmem>>, vector<16x8xf32>
    tpu.vector_store %arg5[%c2, %c0_4], %1 {strides = array<i32>} : memref<24x8xf32, #tpu.memory_space<vmem>>, vector<16x8xf32>,
    %7 = vector.extract_strided_slice %1 {offsets = [15, 0], sizes = [1, 8], strides = [1, 1]} : vector<16x8xf32> to vector<1x8xf32>
    %8 = vector.shape_cast %7 : vector<1x8xf32> to vector<1x8xf32>
    %9 = vector.broadcast %8 : vector<1x8xf32> to vector<6x8xf32>
    %c18 = arith.constant 18 : index
    %c0_5 = arith.constant 0 : index
    %10 = vector.load %arg5[%c18, %c0_5] : memref<24x8xf32, #tpu.memory_space<vmem>>, vector<6x8xf32>
    tpu.vector_store %arg5[%c18, %c0_5], %9 {strides = array<i32>} : memref<24x8xf32, #tpu.memory_space<vmem>>, vector<6x8xf32>,
    %c0_6 = arith.constant 0 : index
    %c0_7 = arith.constant 0 : index
    %11 = vector.load %arg5[%c0_6, %c0_7] : memref<24x8xf32, #tpu.memory_space<vmem>>, vector<24x8xf32>
    %c23_i32 = arith.constant 23 : i32
    %12 = tpu.dynamic_rotate %11 by %c23_i32 dim 0 : vector<24x8xf32>, i32 -> vector<24x8xf32>
    %13 = arith.addf %11, %12 : vector<24x8xf32>
    %c22_i32 = arith.constant 22 : i32
    %14 = tpu.dynamic_rotate %13 by %c22_i32 dim 0 : vector<24x8xf32>, i32 -> vector<24x8xf32>
    %15 = arith.addf %13, %14 : vector<24x8xf32>
    %c23_i32_8 = arith.constant 23 : i32
    %16 = tpu.dynamic_rotate %15 by %c23_i32_8 dim 0 : vector<24x8xf32>, i32 -> vector<24x8xf32>
    %17 = arith.addf %11, %16 : vector<24x8xf32>
    %18 = vector.extract_strided_slice %17 {offsets = [0, 0], sizes = [16, 8], strides = [1, 1]} : vector<24x8xf32> to vector<16x8xf32>
    %cst = arith.constant 2.000000e-01 : f32
    %19 = vector.broadcast %cst : f32 to vector<16x8xf32>
    %20 = arith.mulf %18, %19 : vector<16x8xf32>
    %21 = arith.subf %1, %20 : vector<16x8xf32>
    %c0_9 = arith.constant 0 : index
    %c0_10 = arith.constant 0 : index
    %c0_11 = arith.constant 0 : index
    %22 = vector.load %arg3[%c0_9, %c0_10, %c0_11] : memref<1x16x8xf32, #tpu.memory_space<vmem>>, vector<1x16x8xf32>
    %23 = vector.shape_cast %22 : vector<1x16x8xf32> to vector<16x8xf32>
    %24 = vector.shape_cast %21 : vector<16x8xf32> to vector<1x16x8xf32>
    tpu.vector_store %arg3[%c0_9, %c0_10, %c0_11], %24 {strides = array<i32>} : memref<1x16x8xf32, #tpu.memory_space<vmem>>, vector<1x16x8xf32>,
    %c0_12 = arith.constant 0 : index
    %c0_13 = arith.constant 0 : index
    %c0_14 = arith.constant 0 : index
    %25 = vector.load %arg4[%c0_12, %c0_13, %c0_14] : memref<1x16x8xf32, #tpu.memory_space<vmem>>, vector<1x16x8xf32>
    %26 = vector.shape_cast %25 : vector<1x16x8xf32> to vector<16x8xf32>
    %27 = vector.shape_cast %20 : vector<16x8xf32> to vector<1x16x8xf32>
    tpu.vector_store %arg4[%c0_12, %c0_13, %c0_14], %27 {strides = array<i32>} : memref<1x16x8xf32, #tpu.memory_space<vmem>>, vector<1x16x8xf32>,
    return
  }
  func.func @transform_0(%arg0: i32, %arg1: i32) -> (i32, i32, i32) {
    %c0_i32 = arith.constant 0 : i32
    %c0_i32_0 = arith.constant 0 : i32
    return %arg0, %c0_i32, %arg1 : i32, i32, i32
  }
  func.func @transform_1(%arg0: i32, %arg1: i32) -> (i32, i32, i32) {
    %c0_i32 = arith.constant 0 : i32
    %c0_i32_0 = arith.constant 0 : i32
    return %arg0, %c0_i32, %arg1 : i32, i32, i32
  }
  func.func @transform_2(%arg0: i32, %arg1: i32) -> (i32, i32, i32) {
    %c0_i32 = arith.constant 0 : i32
    %c0_i32_0 = arith.constant 0 : i32
    return %arg0, %c0_i32, %arg1 : i32, i32, i32
  }
}

</mosaic_0001>

<bundles_post_ra>
// kernel: tpu_custom_call.1
= control target key start
LH: loop header
LB: loop body
LE: loop exit
PB: predicated region body
PF: predicated region fallthrough
CT: control target
= control target key end

     0   :  { %s462_s9 = smov 0   ;;  %s464_s10 = smov 0   ;;  %s514_s0 = inlined_call_operand.vmem [shape: f32[2,16,8], index: 0, kind: input, shape index: {}]   ;;  %s515_s1 = inlined_call_operand.vmem [shape: f32[2,16,8], index: 1, kind: output, shape index: {0}]   ;;  %s516_s2 = inlined_call_operand.vmem [shape: f32[2,16,8], index: 2, kind: output, shape index: {1}]  }
   0x1   :  { %s466_s11 = smov 0  }
   0x2 LB: > { %s25_s12 = sadd.s32 1, %s441_s10  ;;  %p387_p0 = scmp.ge.s32.totalorder %s445_s11, 1  ;;  %s445_s11 = sphi %s466_s11, %s13_s11   ;;  %s441_s10 = sphi %s464_s10, %s518_s10   ;;  %s437_s9 = sphi %s462_s9, %s517_s9  }
   0x3   : > { %p27_p1 = scmp.ge.s32.totalorder %s25_s12, 2  ;;  %p136_p2 = scmp.lt.s32.totalorder %s445_s11, 3 }
   0x5   : > { %s520_s12 = smov (%p27_p1, %s25_s12), 0  ;;  %p137_p3 = pnand %p387_p0, %p136_p2 }
   0x6   : > { %p172_p4 = scmp.lt.s32.totalorder (!%p137_p3), %s437_s9, 1  ;;  %v198_v0 = vlaneseq (!%p137_p3)  ;;  %vm204_vm0 = vcmask (!%p137_p3), 64512   ;;  %vm202_vm1 = vcmask (!%p137_p3), 58368   ;;  %vm211_vm2 = vcmask (!%p137_p3), 62464  }
   0x7   : > { %140 = sbr.rel (%p137_p3) target bundleno = 49 (0x31), region = 24 }
   0x8   : > { %v199_v1 = vshrl.u32 (!%p137_p3), %v198_v0, 7 }
   0xa   : > { %v200_v2 = vsub.s32 (!%p137_p3), 0, %v199_v1  ;;  %v209_v3 = vsub.s32 (!%p137_p3), 7, %v199_v1  ;;  %vm221_vm3 = vcmp.lt.s32.totalorder (!%p137_p3), %v199_v1, 7  ;;  %vm231_vm4 = vcmp.lt.s32.totalorder (!%p137_p3), %v199_v1, 6 }
   0xe   : > { %s522_s9 = smov (!%p172_p4, %s437_s9), 1 }
   0xf   : > { %s480_s13 = sshll.u32 %s522_s9, 4 }
  0x10   : > { %s179_s16 = scalar_lea.vmem %s514_s0, %s480_s13  ;;  %s195_s19 = scalar_lea.vmem %s516_s2, %s480_s13 }
  0x11   : > { %v196_v4 = vld [vmem:[%s179_s16] sm:$0xff]  ;;  %v197_v5 = vld [vmem:[%s179_s16 + $0x8] sm:$0xff]  ;;  %s187_s22 = scalar_lea.vmem %s515_s1, %s480_s13 }
  0x12   : > { %v201_v6 = vrot.slane %v196_v4, %v200_v2  ;;  %205 = vst.msk [vmem:[#allocation2 + $0x2] sm:$0xff] %vm204_vm0, %v196_v4  ;;  %206 = vst.msk [vmem:[#allocation2 + $0xa] sm:$0xff] %vm204_vm0, %v197_v5  ;;  %v210_v7 = vrot.slane %v197_v5, %v209_v3 }
  0x14   : > { %203 = vst.msk [vmem:[#allocation2] sm:$0x3] %vm202_vm1, %v201_v6 }
  0x15   : > { %212 = vst.msk [vmem:[#allocation2 + $0x12] sm:$0x3f] %vm211_vm2, %v210_v7 }
  0x19   : > { %v214_v8 = vld [vmem:[#allocation2 + $0x8] sm:$0xff] }
  0x1a   : > { %v217_v9 = vrot.slane %v214_v8, 1 }
  0x1b   : > { %v213_v10 = vld [vmem:[#allocation2] sm:$0xff] }
  0x1c   : > { %v215_v11 = vld [vmem:[#allocation2 + $0x10] sm:$0xff]  ;;  %v216_v12 = vrot.slane %v213_v10, 1 }
  0x1d   : > { %v218_v13 = vrot.slane %v215_v11, 1 }
  0x1e   : > { %v223_v15 = vsel %vm221_vm3, %v216_v12, %v217_v9 }
  0x1f   : > { %v222_v14 = vsel %vm221_vm3, %v217_v9, %v218_v13  ;;  %v224_v16 = vsel %vm221_vm3, %v218_v13, %v216_v12  ;;  %v225_v17 = vadd.f32 %v223_v15, %v213_v10 }
  0x20   : > { %v226_v18 = vadd.f32 %v222_v14, %v214_v8  ;;  %v227_v19 = vadd.f32 %v224_v16, %v215_v11 }
  0x21   : > { %v228_v20 = vrot.slane %v225_v17, 2 }
  0x22   : > { %v229_v21 = vrot.slane %v226_v18, 2  ;;  %v230_v22 = vrot.slane %v227_v19, 2 }
  0x24   : > { %v232_v23 = vsel %vm231_vm4, %v229_v21, %v230_v22  ;;  %v233_v24 = vsel %vm231_vm4, %v228_v20, %v229_v21  ;;  %v234_v25 = vsel %vm231_vm4, %v230_v22, %v228_v20 }
  0x25   : > { %v235_v26 = vadd.f32 %v233_v24, %v225_v17  ;;  %v236_v27 = vadd.f32 %v232_v23, %v226_v18  ;;  %v237_v28 = vadd.f32 %v234_v25, %v227_v19 }
  0x27   : > { %v238_v29 = vrot.slane %v235_v26, 1  ;;  %v239_v30 = vrot.slane %v236_v27, 1  ;;  %v240_v31 = vrot.slane %v237_v28, 1 }
  0x29   : > { %v242_v32 = vsel %vm221_vm3, %v238_v29, %v239_v30  ;;  %v241_v33 = vsel %vm221_vm3, %v239_v30, %v240_v31 }
  0x2a   : > { %v243_v34 = vadd.f32 %v242_v32, %v213_v10  ;;  %v244_v35 = vadd.f32 %v241_v33, %v214_v8 }
  0x2c   : > { %v245_v36 = vmul.f32 0.2, %v243_v34  ;;  %v246_v37 = vmul.f32 0.2, %v244_v35 }
  0x2e   : > { %251 = vst.msk [vmem:[%s195_s19] sm:$0xff] %vm204_vm0, %v245_v36  ;;  %252 = vst.msk [vmem:[%s195_s19 + $0x8] sm:$0xff] %vm204_vm0, %v246_v37  ;;  %v247_v38 = vsub.f32 %v196_v4, %v245_v36  ;;  %v248_v39 = vsub.f32 %v197_v5, %v246_v37 }
  0x30   : > { %249 = vst.msk [vmem:[%s187_s22] sm:$0xff] %vm204_vm0, %v247_v38  ;;  %250 = vst.msk [vmem:[%s187_s22 + $0x8] sm:$0xff] %vm204_vm0, %v248_v39 }
  0x31 PF: > { %s13_s11 = sadd.s32 1, %s445_s11   ;;  %s517_s9 = smov %s441_s10 }
  0x32   : > { %p10_p5 = scmp.ge.s32.totalorder %s13_s11, 4   ;;  %s518_s10 = smov %s520_s12 }
  0x34   :  { %12 = sbr.rel (!%p10_p5) target bundleno = 2 (0x2), region = 66 }

</bundles_post_ra>
